<compile_context>
chip_gen: v7x
topology: tpu7x:2x2x1
jax: 0.10.0
libtpu: 0.0.40
codegen_flags: <defaults>
</compile_context>

<pallas_src>
import math
import jax
import jax.numpy as jnp
from jax.experimental import pallas as pl
from jax.experimental.pallas import tpu as pltpu

# ---- model hyper-parameters (args) ------------------------------------------
HIDDEN = 32            # args.hidden_size
INNER = 4 * HIDDEN     # inner_layer width
SEQ_LEN = 8            # L
BATCH = 4              # B
EPS = 1e-12            # LayerNorm eps


# ---- in-kernel helpers --------------------------------------------------------
def _erf(x):
    # Abramowitz & Stegun 7.1.26 polynomial, |err| < 1.5e-7 (f32-accurate),
    # so GELU matches PyTorch's exact (erf-based) nn.GELU at float32 tolerance.
    ax = jnp.abs(x)
    t = 1.0 / (1.0 + 0.3275911 * ax)
    poly = t * (0.254829592 + t * (-0.284496736 + t * (1.421413741
               + t * (-1.453152027 + t * 1.061405429))))
    y = 1.0 - poly * jnp.exp(-ax * ax)
    return jnp.where(x < 0.0, -y, y)


def _gelu_exact(x):
    return 0.5 * x * (1.0 + _erf(x * 0.7071067811865476))


def _layernorm(x, gamma, beta):
    mu = jnp.mean(x, axis=-1, keepdims=True)
    var = jnp.mean(jnp.square(x - mu), axis=-1, keepdims=True)
    return (x - mu) * jax.lax.rsqrt(var + EPS) * gamma + beta


# ---- fused FeedForward kernel --------------------------------------------------
def feedforward_kernel(x_ref, w1_ref, b1_ref, w2_ref, b2_ref, g_ref, bt_ref, out_ref):
    x = x_ref[...]                                                   # (B*L, E)
    # inner_layer: (B*L, E) @ (E, 4E) + b1  -> (B*L, 4E)  (lane-dense 128-wide)
    h = jnp.dot(x, w1_ref[...], preferred_element_type=jnp.float32) + b1_ref[...]
    h = _gelu_exact(h)
    # outer_layer: (B*L, 4E) @ (4E, E) + b2 -> (B*L, E)
    h = jnp.dot(h, w2_ref[...], preferred_element_type=jnp.float32) + b2_ref[...]
    # dropout is identity in eval mode
    out_ref[...] = _layernorm(h + x, g_ref[...], bt_ref[...])


# ---- wrapper -------------------------------------------------------------------
def feedforward(seq, p):
    """seq: (B, L, E) float32. Weights pre-transposed to (in, out); biases (1, out)."""
    B, L, E = seq.shape
    I = p["w1"].shape[1]
    x2 = seq.reshape(B * L, E)            # flatten batch -> one matmul per Linear
    vmem = pl.BlockSpec(memory_space=pltpu.MemorySpace.VMEM)   # whole array in VMEM
    out2 = pl.pallas_call(
        feedforward_kernel,
        out_shape=jax.ShapeDtypeStruct((B * L, E), jnp.float32),
        in_specs=[vmem] * 7,
        out_specs=vmem,
    )(x2, p["w1"], p["b1"], p["w2"], p["b2"], p["ln_g"], p["ln_b"])
    return out2.reshape(B, L, E)


# ---- pure-JAX reference (same math, no Pallas) ----------------------------------
def feedforward_ref(seq, p):
    h = jnp.dot(seq, p["w1"]) + p["b1"]
    h = _gelu_exact(h)
    h = jnp.dot(h, p["w2"]) + p["b2"]
    y = h + seq
    mu = jnp.mean(y, axis=-1, keepdims=True)
    var = jnp.mean(jnp.square(y - mu), axis=-1, keepdims=True)
    return (y - mu) / jnp.sqrt(var + EPS) * p["ln_g"] + p["ln_b"]


# ---- deterministic parameter init (shapes follow the PyTorch __init__) ----------
def _init_linear(key, fan_in, fan_out):
    kw, kb = jax.random.split(key)
    w = jax.random.normal(kw, (fan_in, fan_out), jnp.float32) * 0.02
    b = jax.random.normal(kb, (1, fan_out), jnp.float32) * 0.02
    return w, b


def init_ffn_params(key):
    k1, k2 = jax.random.split(key)
    w1, b1 = _init_linear(k1, HIDDEN, INNER)
    w2, b2 = _init_linear(k2, INNER, HIDDEN)
    return dict(w1=w1, b1=b1, w2=w2, b2=b2,
                ln_g=jnp.ones((1, HIDDEN), jnp.float32),
                ln_b=jnp.zeros((1, HIDDEN), jnp.float32))


# ---- main -----------------------------------------------------------------------
if __name__ == "__main__":
    root = jax.random.PRNGKey(0)
    k_seq, k_ffn = jax.random.split(root, 2)

    params = init_ffn_params(k_ffn)
    seq = jax.random.normal(k_seq, (BATCH, SEQ_LEN, HIDDEN), jnp.float32)

    out = feedforward(seq, params)
    out = jax.block_until_ready(out)
    assert out.shape == (BATCH, SEQ_LEN, HIDDEN)
    assert bool(jnp.all(jnp.isfinite(out)))

    # sanity check against the pure-JAX reference (loose tol: MXU f32 passes)
    ref = feedforward_ref(seq, params)
    max_err = float(jnp.max(jnp.abs(out - ref)))
    assert max_err < 2e-2, f"max abs error vs reference too large: {max_err}"

    print("KERNEL_OK")
</pallas_src>

<mosaic_0001>
module attributes {stable_mosaic.version = 11 : i64} {
  func.func @feedforward_kernel(%arg0: memref<32x32xf32, #tpu.memory_space<vmem>>, %arg1: memref<32x128xf32, #tpu.memory_space<vmem>>, %arg2: memref<1x128xf32, #tpu.memory_space<vmem>>, %arg3: memref<128x32xf32, #tpu.memory_space<vmem>>, %arg4: memref<1x32xf32, #tpu.memory_space<vmem>>, %arg5: memref<1x32xf32, #tpu.memory_space<vmem>>, %arg6: memref<1x32xf32, #tpu.memory_space<vmem>>, %arg7: memref<32x32xf32, #tpu.memory_space<vmem>>) attributes {dimension_semantics = [], scalar_prefetch = 0 : i64, scratch_operands = 0 : i64, tpu.core_type = #tpu.core_type<tc>} {
    %c0 = arith.constant 0 : index
    %c0_0 = arith.constant 0 : index
    %0 = vector.load %arg0[%c0, %c0_0] : memref<32x32xf32, #tpu.memory_space<vmem>>, vector<32x32xf32>
    %c0_1 = arith.constant 0 : index
    %c0_2 = arith.constant 0 : index
    %1 = vector.load %arg1[%c0_1, %c0_2] : memref<32x128xf32, #tpu.memory_space<vmem>>, vector<32x128xf32>
    %cst = arith.constant dense<0.000000e+00> : vector<32x128xf32>
    %2 = tpu.matmul %0, %1, %cst {dimension_numbers = #tpu.dot_dimension_numbers<[1], [0], [0], [1], [0, 0, 1, 1], [], []>} : vector<32x32xf32>, vector<32x128xf32>, vector<32x128xf32> -> vector<32x128xf32>
    %c0_3 = arith.constant 0 : index
    %c0_4 = arith.constant 0 : index
    %3 = vector.load %arg2[%c0_3, %c0_4] : memref<1x128xf32, #tpu.memory_space<vmem>>, vector<1x128xf32>
    %4 = vector.broadcast %3 : vector<1x128xf32> to vector<32x128xf32>
    %5 = arith.addf %2, %4 : vector<32x128xf32>
    %cst_5 = arith.constant 5.000000e-01 : f32
    %6 = vector.broadcast %cst_5 : f32 to vector<32x128xf32>
    %7 = arith.mulf %6, %5 : vector<32x128xf32>
    %cst_6 = arith.constant 0.707106769 : f32
    %8 = vector.broadcast %cst_6 : f32 to vector<32x128xf32>
    %9 = arith.mulf %5, %8 : vector<32x128xf32>
    %10 = math.absf %9 : vector<32x128xf32>
    %cst_7 = arith.constant 0.327591091 : f32
    %11 = vector.broadcast %cst_7 : f32 to vector<32x128xf32>
    %12 = arith.mulf %11, %10 : vector<32x128xf32>
    %cst_8 = arith.constant 1.000000e+00 : f32
    %13 = vector.broadcast %cst_8 : f32 to vector<32x128xf32>
    %14 = arith.addf %13, %12 : vector<32x128xf32>
    %cst_9 = arith.constant 1.000000e+00 : f32
    %15 = vector.broadcast %cst_9 : f32 to vector<32x128xf32>
    %16 = arith.divf %15, %14 : vector<32x128xf32>
    %cst_10 = arith.constant 1.06140542 : f32
    %17 = vector.broadcast %cst_10 : f32 to vector<32x128xf32>
    %18 = arith.mulf %16, %17 : vector<32x128xf32>
    %cst_11 = arith.constant -1.45315206 : f32
    %19 = vector.broadcast %cst_11 : f32 to vector<32x128xf32>
    %20 = arith.addf %19, %18 : vector<32x128xf32>
    %21 = arith.mulf %16, %20 : vector<32x128xf32>
    %cst_12 = arith.constant 1.42141378 : f32
    %22 = vector.broadcast %cst_12 : f32 to vector<32x128xf32>
    %23 = arith.addf %22, %21 : vector<32x128xf32>
    %24 = arith.mulf %16, %23 : vector<32x128xf32>
    %cst_13 = arith.constant -0.284496725 : f32
    %25 = vector.broadcast %cst_13 : f32 to vector<32x128xf32>
    %26 = arith.addf %25, %24 : vector<32x128xf32>
    %27 = arith.mulf %16, %26 : vector<32x128xf32>
    %cst_14 = arith.constant 0.254829586 : f32
    %28 = vector.broadcast %cst_14 : f32 to vector<32x128xf32>
    %29 = arith.addf %28, %27 : vector<32x128xf32>
    %30 = arith.mulf %16, %29 : vector<32x128xf32>
    %cst_15 = arith.constant 0.000000e+00 : f32
    %31 = vector.broadcast %cst_15 : f32 to vector<32x128xf32>
    %32 = arith.subf %31, %10 : vector<32x128xf32>
    %33 = arith.mulf %32, %10 : vector<32x128xf32>
    %34 = math.exp %33 : vector<32x128xf32>
    %35 = arith.mulf %30, %34 : vector<32x128xf32>
    %cst_16 = arith.constant 1.000000e+00 : f32
    %36 = vector.broadcast %cst_16 : f32 to vector<32x128xf32>
    %37 = arith.subf %36, %35 : vector<32x128xf32>
    %cst_17 = arith.constant 0.000000e+00 : f32
    %38 = vector.broadcast %cst_17 : f32 to vector<32x128xf32>
    %39 = arith.cmpf olt, %9, %38 : vector<32x128xf32>
    %cst_18 = arith.constant 0.000000e+00 : f32
    %40 = vector.broadcast %cst_18 : f32 to vector<32x128xf32>
    %41 = arith.subf %40, %37 : vector<32x128xf32>
    %42 = arith.select %39, %41, %37 : vector<32x128xi1>, vector<32x128xf32>
    %cst_19 = arith.constant 1.000000e+00 : f32
    %43 = vector.broadcast %cst_19 : f32 to vector<32x128xf32>
    %44 = arith.addf %43, %42 : vector<32x128xf32>
    %45 = arith.mulf %7, %44 : vector<32x128xf32>
    %c0_20 = arith.constant 0 : index
    %c0_21 = arith.constant 0 : index
    %46 = vector.load %arg3[%c0_20, %c0_21] : memref<128x32xf32, #tpu.memory_space<vmem>>, vector<128x32xf32>
    %cst_22 = arith.constant dense<0.000000e+00> : vector<32x32xf32>
    %47 = tpu.matmul %45, %46, %cst_22 {dimension_numbers = #tpu.dot_dimension_numbers<[1], [0], [0], [1], [0, 0, 1, 1], [], []>} : vector<32x128xf32>, vector<128x32xf32>, vector<32x32xf32> -> vector<32x32xf32>
    %c0_23 = arith.constant 0 : index
    %c0_24 = arith.constant 0 : index
    %48 = vector.load %arg4[%c0_23, %c0_24] : memref<1x32xf32, #tpu.memory_space<vmem>>, vector<1x32xf32>
    %49 = vector.broadcast %48 : vector<1x32xf32> to vector<32x32xf32>
    %50 = arith.addf %47, %49 : vector<32x32xf32>
    %51 = arith.addf %50, %0 : vector<32x32xf32>
    %c0_25 = arith.constant 0 : index
    %c0_26 = arith.constant 0 : index
    %52 = vector.load %arg5[%c0_25, %c0_26] : memref<1x32xf32, #tpu.memory_space<vmem>>, vector<1x32xf32>
    %c0_27 = arith.constant 0 : index
    %c0_28 = arith.constant 0 : index
    %53 = vector.load %arg6[%c0_27, %c0_28] : memref<1x32xf32, #tpu.memory_space<vmem>>, vector<1x32xf32>
    %cst_29 = arith.constant dense<0.000000e+00> : vector<32xf32>
    %54 = vector.multi_reduction <add>, %51, %cst_29 [1] : vector<32x32xf32> to vector<32xf32>
    %55 = vector.shape_cast %54 : vector<32xf32> to vector<32x1xf32>
    %cst_30 = arith.constant 3.200000e+01 : f32
    %56 = vector.broadcast %cst_30 : f32 to vector<32x1xf32>
    %57 = arith.divf %55, %56 : vector<32x1xf32>
    %58 = vector.broadcast %57 : vector<32x1xf32> to vector<32x32xf32>
    %59 = arith.subf %51, %58 : vector<32x32xf32>
    %60 = arith.mulf %59, %59 : vector<32x32xf32>
    %cst_31 = arith.constant dense<0.000000e+00> : vector<32xf32>
    %61 = vector.multi_reduction <add>, %60, %cst_31 [1] : vector<32x32xf32> to vector<32xf32>
    %62 = vector.shape_cast %61 : vector<32xf32> to vector<32x1xf32>
    %cst_32 = arith.constant 3.200000e+01 : f32
    %63 = vector.broadcast %cst_32 : f32 to vector<32x1xf32>
    %64 = arith.divf %62, %63 : vector<32x1xf32>
    %65 = vector.broadcast %57 : vector<32x1xf32> to vector<32x32xf32>
    %66 = arith.subf %51, %65 : vector<32x32xf32>
    %cst_33 = arith.constant 9.99999996E-13 : f32
    %67 = vector.broadcast %cst_33 : f32 to vector<32x1xf32>
    %68 = arith.addf %64, %67 : vector<32x1xf32>
    %69 = math.rsqrt %68 : vector<32x1xf32>
    %70 = vector.broadcast %69 : vector<32x1xf32> to vector<32x32xf32>
    %71 = arith.mulf %66, %70 : vector<32x32xf32>
    %72 = vector.broadcast %52 : vector<1x32xf32> to vector<32x32xf32>
    %73 = arith.mulf %71, %72 : vector<32x32xf32>
    %74 = vector.broadcast %53 : vector<1x32xf32> to vector<32x32xf32>
    %75 = arith.addf %73, %74 : vector<32x32xf32>
    %c0_34 = arith.constant 0 : index
    %c0_35 = arith.constant 0 : index
    %76 = vector.load %arg7[%c0_34, %c0_35] : memref<32x32xf32, #tpu.memory_space<vmem>>, vector<32x32xf32>
    tpu.vector_store %arg7[%c0_34, %c0_35], %75 {strides = array<i32>} : memref<32x32xf32, #tpu.memory_space<vmem>>, vector<32x32xf32>,
    return
  }
}

</mosaic_0001>

<bundles_post_ra>
// kernel: tpu_custom_call.1
= control target key start
LH: loop header
LB: loop body
LE: loop exit
PB: predicated region body
PF: predicated region fallthrough
CT: control target
= control target key end

     0   :  { %vm42_vm0 = vcmask 261120   ;;  %s837_s0 = inlined_call_operand.vmem [shape: f32[32,32], index: 0, kind: input, shape index: {}]   ;;  %s838_s1 = inlined_call_operand.vmem [shape: f32[32,128], index: 1, kind: input, shape index: {}]   ;;  %s839_s2 = inlined_call_operand.vmem [shape: f32[1,128], index: 2, kind: input, shape index: {}]   ;;  %s840_s3 = inlined_call_operand.vmem [shape: f32[128,32], index: 3, kind: input, shape index: {}]   ;;  %s841_s4 = inlined_call_operand.vmem [shape: f32[1,32], index: 4, kind: input, shape index: {}]   ;;  %s842_s5 = inlined_call_operand.vmem [shape: f32[1,32], index: 5, kind: input, shape index: {}]   ;;  %s843_s6 = inlined_call_operand.vmem [shape: f32[1,32], index: 6, kind: input, shape index: {}]   ;;  %s844_s7 = inlined_call_operand.hbm [shape: f32[32,32], index: 7, kind: output, shape index: {}]  }
   0x1   :  { %v31_v0 = vld [vmem:[%s838_s1] sm:$0xff]  ;;  %v32_v1 = vld [vmem:[%s838_s1 + $0x8] sm:$0xff]  ;;  %v33_v2 = vld [vmem:[%s838_s1 + $0x10] sm:$0xff] }
   0x2   :  { %v543_v3 = vpack.c.bf16 %v32_v1, %v31_v0  ;;  %v34_v4 = vld [vmem:[%s838_s1 + $0x18] sm:$0xff]  ;;  %v692_v5 = vld [vmem:[%s837_s0] sm:$0xff] }
   0x3   :  { %v547_v6 = vpack.c.bf16 %v34_v4, %v33_v2  ;;  %499 = vmatprep.mubr.msk.f32.mxu0 %vm42_vm0, %v692_v5 }
   0x4   :  { %12 = vsyncpa [#allocation3], 0  ;;  %544 = vmatprep.subr.bf16.mxu0 %v543_v3  ;;  %v699_v7 = vld [vmem:[%s837_s0 + $0x8] sm:$0xff]  ;;  %v704_v8 = vld [vmem:[%s837_s0 + $0x10] sm:$0xff] }
   0x5   :  { %546 = vmatpush3.bf16.msra.mxu0 %v543_v3  ;;  %v713_v9 = vld [vmem:[%s837_s0 + $0x18] sm:$0xff]  ;;  %v248_v10 = vld [vmem:[%s840_s3] sm:$0xff]  ;;  %v249_v11 = vld [vmem:[%s840_s3 + $0x8] sm:$0xff] }
   0x6   :  { %548 = vmatprep.subr.bf16.mxu0 %v547_v6  ;;  %v250_v12 = vld [vmem:[%s840_s3 + $0x10] sm:$0xff]  ;;  %v551_v13 = vpack.c.bf16 %v249_v11, %v248_v10  ;;  %v251_v14 = vld [vmem:[%s840_s3 + $0x18] sm:$0xff]  ;;  %v252_v16 = vld [vmem:[%s840_s3 + $0x20] sm:$0xff] }
   0x7   :  { %v555_v15 = vpack.c.bf16 %v251_v14, %v250_v12  ;;  %v253_v17 = vld [vmem:[%s840_s3 + $0x28] sm:$0xff]  ;;  %v254_v19 = vld [vmem:[%s840_s3 + $0x30] sm:$0xff]  ;;  %v255_v20 = vld [vmem:[%s840_s3 + $0x38] sm:$0xff] }
   0x8   :  { %552 = vmatprep.subr.bf16.mxu1 %v551_v13  ;;  %v559_v18 = vpack.c.bf16 %v253_v17, %v252_v16  ;;  %v563_v21 = vpack.c.bf16 %v255_v20, %v254_v19  ;;  %v256_v22 = vld [vmem:[%s840_s3 + $0x40] sm:$0xff]  ;;  %v257_v23 = vld [vmem:[%s840_s3 + $0x48] sm:$0xff]  ;;  %v258_v25 = vld [vmem:[%s840_s3 + $0x50] sm:$0xff] }
   0x9   :  { %550 = vmatpush3.bf16.msra.mxu0 %v547_v6  ;;  %554 = vmatpush3.bf16.msra.mxu1 %v551_v13  ;;  %v567_v24 = vpack.c.bf16 %v257_v23, %v256_v22  ;;  %v259_v26 = vld [vmem:[%s840_s3 + $0x58] sm:$0xff]  ;;  %v260_v28 = vld [vmem:[%s840_s3 + $0x60] sm:$0xff]  ;;  %v261_v29 = vld [vmem:[%s840_s3 + $0x68] sm:$0xff] }
   0xa   :  { %556 = vmatprep.subr.bf16.mxu1 %v555_v15  ;;  %v571_v27 = vpack.c.bf16 %v259_v26, %v258_v25  ;;  %v575_v30 = vpack.c.bf16 %v261_v29, %v260_v28  ;;  %v262_v31 = vld [vmem:[%s840_s3 + $0x70] sm:$0xff]  ;;  %v263_v32 = vld [vmem:[%s840_s3 + $0x78] sm:$0xff]  ;;  %v455_v34 = vld [vmem:[%s839_s2] ss:$0 sm:$0xff] }
   0xb   :  { %v579_v33 = vpack.c.bf16 %v263_v32, %v262_v31 }
   0xc   :  { %500 = vmatmul.mubr.msk.f32.vlgmr.msra.gmra.mrb[0].mxu0 %vm42_vm0, %v699_v7 }
   0xd   :  { %502 = vmatprep.mubr.msk.f32.mxu0 %vm42_vm0, %v704_v8  ;;  %558 = vmatpush3.bf16.msra.mxu1 %v555_v15 }
   0xe   :  { %560 = vmatprep.subr.bf16.mxu1 %v559_v18 }
  0x10   :  { %503 = vmatmul.mubr.msk.f32.gmra.mrb[2].mxu0 %vm42_vm0, %v713_v9 }
  0x11   :  { %562 = vmatpush3.bf16.msra.mxu1 %v559_v18 }
  0x12   :  { %564 = vmatprep.subr.bf16.mxu1 %v563_v21 }
  0x15   :  { %566 = vmatpush3.bf16.msra.mxu1 %v563_v21 }
  0x16   :  { %568 = vmatprep.subr.bf16.mxu1 %v567_v24 }
  0x19   :  { %570 = vmatpush3.bf16.msra.mxu1 %v567_v24 }
  0x1a   :  { %572 = vmatprep.subr.bf16.mxu1 %v571_v27 }
  0x1d   :  { %574 = vmatpush3.bf16.msra.mxu1 %v571_v27 }
  0x1e   :  { %576 = vmatprep.subr.bf16.mxu1 %v575_v30 }
  0x21   :  { %578 = vmatpush3.bf16.msra.mxu1 %v575_v30 }
  0x22   :  { %580 = vmatprep.subr.bf16.mxu1 %v579_v33 }
  0x25   :  { %582 = vmatpush3.bf16.msra.mxu1 %v579_v33 }
  0xdf   :  { %v501_v35 = vpop.f32.mrb[0].mxu0 }
  0xe0   :  { %v768_v36 = vadd.f32 %v501_v35, %v455_v34  ;;  %v121_v37 = vpop.f32.mrb[1].mxu0 }
  0xe1   :  { %v770_v38 = vadd.f32 %v455_v34, %v121_v37 }
  0xe2   :  { %v773_v39 = vmul.f32 0.70710677, %v768_v36 }
  0xe3   :  { %v776_v40 = vmul.f32 0.70710677, %v770_v38  ;;  %v504_v41 = vpop.f32.mrb[2].mxu0 }
  0xe4   :  { %v149_v42 = vand.u32 2147483647, %v773_v39  ;;  %v779_v43 = vadd.f32 %v504_v41, %v455_v34  ;;  %v131_v44 = vpop.f32.mrb[3].mxu0  ;;  %vm229_vm1 = vcmp.lt.f32.partialorder %v773_v39, 0.0 }
  0xe5   :  { %v148_v45 = vand.u32 2147483647, %v776_v40  ;;  %v782_v46 = vadd.f32 %v455_v34, %v131_v44  ;;  %vm228_vm2 = vcmp.lt.f32.partialorder %v776_v40, 0.0 }
  0xe6   :  { %v153_v47 = vmul.f32 0.3275911, %v149_v42  ;;  %v785_v48 = vmul.f32 0.70710677, %v779_v43  ;;  %v205_v59 = vsub.f32 0.0, %v149_v42 }
  0xe7   :  { %v152_v49 = vmul.f32 0.3275911, %v148_v45  ;;  %v788_v50 = vmul.f32 0.70710677, %v782_v46  ;;  %v204_v60 = vsub.f32 0.0, %v148_v45 }
  0xe8   :  { %v157_v51 = vadd.f32 1.0, %v153_v47  ;;  %v151_v52 = vand.u32 2147483647, %v785_v48  ;;  %v209_v62 = vmul.f32 %v205_v59, %v149_v42  ;;  %vm231_vm3 = vcmp.lt.f32.partialorder %v785_v48, 0.0 }
  0xe9   :  { %v156_v53 = vadd.f32 1.0, %v152_v49  ;;  %v150_v54 = vand.u32 2147483647, %v788_v50  ;;  %v208_v1 = vmul.f32 %v204_v60, %v148_v45  ;;  %vm230_vm4 = vcmp.lt.f32.partialorder %v788_v50, 0.0 }
  0xea   :  { %586 = vrcp.f32 %v157_v51  ;;  %v155_v55 = vmul.f32 0.3275911, %v151_v52  ;;  %v207_v63 = vsub.f32 0.0, %v151_v52  ;;  %v214_v11 = vmul.f32 1.442695, %v209_v62 }
  0xeb   :  { %588 = vrcp.f32 %v156_v53  ;;  %v154_v56 = vmul.f32 0.3275911, %v150_v54  ;;  %v206_v2 = vsub.f32 0.0, %v150_v54  ;;  %v212_v15 = vmul.f32 1.442695, %v208_v1 }
  0xec   :  { %v159_v57 = vadd.f32 1.0, %v155_v55  ;;  %v211_v12 = vmul.f32 %v207_v63, %v151_v52 }
  0xed   :  { %v158_v58 = vadd.f32 1.0, %v154_v56  ;;  %v210_v16 = vmul.f32 %v206_v2, %v150_v54 }
  0xee   :  { %590 = vrcp.f32 %v159_v57  ;;  %v218_v23 = vmul.f32 1.442695, %v211_v12 }
  0xef   :  { %592 = vrcp.f32 %v158_v58  ;;  %v216_v26 = vmul.f32 1.442695, %v210_v16 }
  0xf0   :  { %594 = vpow2.f32 %v214_v11 }
  0xf1   :  { %596 = vpow2.f32 %v212_v15 }
  0xf2   :  { %598 = vpow2.f32 %v218_v23 }
  0xf3   :  { %600 = vpow2.f32 %v216_v26 }
  0xf4   :  { %v587_v61 = vpop.eup %586 }
  0xf5   :  { %v589_v0 = vpop.eup %588  ;;  %v169_v3 = vmul.f32 1.0614054, %v587_v61 }
  0xf6   :  { %v168_v4 = vmul.f32 1.0614054, %v589_v0 }
  0xf7   :  { %v173_v6 = vadd.f32 -1.4531521, %v169_v3 }
  0xf8   :  { %v591_v10 = vpop.eup %590  ;;  %v172_v13 = vadd.f32 -1.4531521, %v168_v4 }
  0xf9   :  { %v593_v14 = vpop.eup %592  ;;  %v177_v17 = vmul.f32 %v587_v61, %v173_v6  ;;  %v171_v18 = vmul.f32 1.0614054, %v591_v10 }
  0xfa   :  { %v176_v19 = vmul.f32 %v589_v0, %v172_v13  ;;  %v170_v20 = vmul.f32 1.0614054, %v593_v14  ;;  %v595_v53 = vpop.eup %594 }
  0xfb   :  { %v181_v21 = vadd.f32 1.4214138, %v177_v17  ;;  %v175_v22 = vadd.f32 -1.4531521, %v171_v18  ;;  %v597_v56 = vpop.eup %596  ;;  %v140_v18 = vmul.f32 0.5, %v770_v38  ;;  %v143_v38 = vmul.f32 0.5, %v779_v43 }
  0xfc   :  { %v180_v24 = vadd.f32 1.4214138, %v176_v19  ;;  %v174_v25 = vadd.f32 -1.4531521, %v170_v20  ;;  %v599_v1 = vpop.eup %598 }
  0xfd   :  { %v185_v27 = vmul.f32 %v587_v61, %v181_v21  ;;  %v179_v28 = vmul.f32 %v591_v10, %v175_v22  ;;  %v601_v4 = vpop.eup %600 }
  0xfe   :  { %v184_v29 = vmul.f32 %v589_v0, %v180_v24  ;;  %v178_v30 = vmul.f32 %v593_v14, %v174_v25  ;;  %v142_v24 = vmul.f32 0.5, %v782_v46 }
  0xff   :  { %v189_v31 = vadd.f32 -0.28449672, %v185_v27  ;;  %v183_v32 = vadd.f32 1.4214138, %v179_v28 }
 0x100   :  { %v188_v33 = vadd.f32 -0.28449672, %v184_v29  ;;  %v182_v34 = vadd.f32 1.4214138, %v178_v30 }
 0x101   :  { %v193_v35 = vmul.f32 %v587_v61, %v189_v31  ;;  %v187_v37 = vmul.f32 %v591_v10, %v183_v32 }
 0x102   :  { %v192_v41 = vmul.f32 %v589_v0, %v188_v33  ;;  %v186_v42 = vmul.f32 %v593_v14, %v182_v34 }
 0x103   :  { %v197_v44 = vadd.f32 0.2548296, %v193_v35  ;;  %v191_v45 = vadd.f32 -0.28449672, %v187_v37 }
 0x104   :  { %v196_v47 = vadd.f32 0.2548296, %v192_v41  ;;  %v190_v49 = vadd.f32 -0.28449672, %v186_v42 }
 0x105   :  { %v201_v51 = vmul.f32 %v587_v61, %v197_v44  ;;  %v195_v52 = vmul.f32 %v591_v10, %v191_v45 }
 0x106   :  { %v200_v54 = vmul.f32 %v589_v0, %v196_v47  ;;  %v194_v55 = vmul.f32 %v593_v14, %v190_v49 }
 0x107   :  { %v221_v57 = vmul.f32 %v595_v53, %v201_v51  ;;  %v199_v58 = vadd.f32 0.2548296, %v195_v52 }
 0x108   :  { %v220_v59 = vmul.f32 %v597_v56, %v200_v54  ;;  %v198_v60 = vadd.f32 0.2548296, %v194_v55 }
 0x109   :  { %v225_v62 = vsub.f32 1.0, %v221_v57  ;;  %v203_v63 = vmul.f32 %v591_v10, %v199_v58 }
 0x10a   :  { %v224_v2 = vsub.f32 1.0, %v220_v59  ;;  %v202_v3 = vmul.f32 %v593_v14, %v198_v60  ;;  %v141_v14 = vmul.f32 0.5, %v768_v36  ;;  %v460_v36 = vld [vmem:[%s841_s4] ss:$0 sm:$0xff] }
 0x10b   :  { %v233_v6 = vsub.f32 0.0, %v225_v62  ;;  %v223_v11 = vmul.f32 %v599_v1, %v203_v63 }
 0x10c   :  { %v232_v61 = vsub.f32 0.0, %v224_v2  ;;  %v222_v12 = vmul.f32 %v601_v4, %v202_v3 }
 0x10d   :  { %v237_v0 = vsel %vm229_vm1, %v233_v6, %v225_v62  ;;  %v227_v13 = vsub.f32 1.0, %v223_v11 }
 0x10e   :  { %v236_v15 = vsel %vm228_vm2, %v232_v61, %v224_v2  ;;  %v241_v16 = vadd.f32 1.0, %v237_v0  ;;  %v226_v17 = vsub.f32 1.0, %v222_v12 }
 0x10f   :  { %v240_v10 = vadd.f32 1.0, %v236_v15  ;;  %v235_v19 = vsub.f32 0.0, %v227_v13 }
 0x110   :  { %v234_v20 = vsub.f32 0.0, %v226_v17  ;;  %v245_v22 = vmul.f32 %v241_v16, %v141_v14  ;;  %v462_v14 = vld [vmem:[%s843_s6] ss:$0 sm:$0xff] }
 0x111   :  { %v244_v39 = vmul.f32 %v240_v10, %v140_v18  ;;  %v239_v21 = vsel %vm231_vm3, %v235_v19, %v227_v13  ;;  %v461_v10 = vld [vmem:[%s842_s5] ss:$0 sm:$0xff]  ;;  %s634_s5 = smov [#allocation2]  }
 0x112   :  { %v238_v40 = vsel %vm230_vm4, %v234_v20, %v226_v17  ;;  %v243_v23 = vadd.f32 1.0, %v239_v21  ;;  %s444_s27 = sshll.u32 %s634_s5, 4  ;;  %s445_s27 = int_to_ptr.vmem [resolvable:$true] %s444_s27 }
 0x113   :  { %537 = vmatprep.mubr.f32.mxu1 %v244_v39  ;;  %v242_v25 = vadd.f32 1.0, %v238_v40  ;;  %s610_s6 = scalar_lea.vmem %s445_s27, 512  ;;  %p615_p1 = scmp.lt.s32.totalorder %s445_s27, %s445_s27 }
 0x114   :  { %538 = vmatmul.mubr.f32.vlgmr.msra.gmra.mrb[0].mxu1 %v245_v22  ;;  %v247_v27 = vmul.f32 %v243_v23, %v143_v38  ;;  %p611_p0 = scmp.ne.s32.totalorder %s445_s27, %s610_s6  ;;  %p616_p2 = scmp.lt.s32.totalorder %s610_s6, %s610_s6 }
 0x115   :  { %v246_v26 = vmul.f32 %v242_v25, %v142_v24 }
 0x116   :  { %p617_p3 = por %p616_p2, %p615_p1 }
 0x117   :  { %540 = vmatprep.mubr.f32.mxu1 %v246_v26 }
 0x118   :  { %541 = vmatmul.mubr.f32.gmra.mrb[2].mxu1 %v247_v27  ;;  %p618_p4 = pnand %p617_p3, %p611_p0 }
 0x1e7   :  { %v539_v48 = vpop.f32.mrb[0].mxu1 }
 0x1e8   :  { %v337_v50 = vpop.f32.mrb[1].mxu1  ;;  %v343_v28 = vadd.f32 %v539_v48, %v460_v36 }
 0x1e9   :  { %v338_v29 = vadd.f32 %v460_v36, %v337_v50 }
 0x1ea   :  { %v357_v34 = vadd.f32 %v343_v28, %v699_v7 }
 0x1eb   :  { %v542_v30 = vpop.f32.mrb[2].mxu1  ;;  %v356_v46 = vadd.f32 %v338_v29, %v692_v5 }
 0x1ec   :  { %v347_v31 = vpop.f32.mrb[3].mxu1  ;;  %v353_v32 = vadd.f32 %v542_v30, %v460_v36  ;;  %v365_v41 = vsel %vm42_vm0, %v357_v34, 0.0 }
 0x1ed   :  { %v348_v33 = vadd.f32 %v460_v36, %v347_v31  ;;  %v362_v43 = vsel %vm42_vm0, %v356_v46, 0.0 }
 0x1ee   :  { %363 = vadd.xlane.f32.xlu0 %v362_v43  ;;  %v359_v42 = vadd.f32 %v353_v32, %v713_v9 }
 0x1ef   :  { %v358_v35 = vadd.f32 %v348_v33, %v704_v8 }
 0x1f0   :  { %v371_v5 = vsel %vm42_vm0, %v359_v42, 0.0 }
 0x1f1   :  { %v368_v37 = vsel %vm42_vm0, %v358_v35, 0.0 }
 0x1f2   :  { %369 = vadd.xlane.f32.xlu1 %v368_v37  ;;  %366 = vadd.xlane.f32.xlu0 %v365_v41 }
 0x1f6   :  { %372 = vadd.xlane.f32.xlu1 %v371_v5 }
 0x27b   :  { %v364_v44 = vpop.xlane.xlu0 %363 }
 0x27c   :  { %v375_v45 = vmul.f32 0.03125, %v364_v44 }
 0x27e   :  { %v379_v47 = vsub.f32 %v356_v46, %v375_v45 }
 0x27f   :  { %v370_v49 = vpop.xlane.xlu1 %369  ;;  %v367_v51 = vpop.xlane.xlu0 %366 }
 0x280   :  { %v377_v7 = vmul.f32 0.03125, %v370_v49  ;;  %v376_v52 = vmul.f32 0.03125, %v367_v51  ;;  %v383_v53 = vmul.f32 %v379_v47, %v379_v47 }
 0x282   :  { %v381_v8 = vsub.f32 %v358_v35, %v377_v7  ;;  %v380_v54 = vsub.f32 %v357_v34, %v376_v52  ;;  %v387_v55 = vsel %vm42_vm0, %v383_v53, 0.0 }
 0x283   :  { %v373_v56 = vpop.xlane.xlu1 %372  ;;  %388 = vadd.xlane.f32.xlu0 %v387_v55 }
 0x284   :  { %v378_v9 = vmul.f32 0.03125, %v373_v56  ;;  %v385_v57 = vmul.f32 %v381_v8, %v381_v8  ;;  %v384_v58 = vmul.f32 %v380_v54, %v380_v54 }
 0x286   :  { %v382_v59 = vsub.f32 %v359_v42, %v378_v9  ;;  %v393_v60 = vsel %vm42_vm0, %v385_v57, 0.0  ;;  %v390_v62 = vsel %vm42_vm0, %v384_v58, 0.0 }
 0x287   :  { %394 = vadd.xlane.f32.xlu0 %v393_v60  ;;  %391 = vadd.xlane.f32.xlu1 %v390_v62 }
 0x288   :  { %v386_v63 = vmul.f32 %v382_v59, %v382_v59 }
 0x28a   :  { %v396_v1 = vsel %vm42_vm0, %v386_v63, 0.0 }
 0x28b   :  { %397 = vadd.xlane.f32.xlu1 %v396_v1 }
 0x310   :  { %v389_v2 = vpop.xlane.xlu0 %388 }
 0x311   :  { %v399_v3 = vmul.f32 0.03125, %v389_v2 }
 0x313   :  { %v403_v4 = vadd.f32 1e-12, %v399_v3 }
 0x314   :  { %v392_v6 = vpop.xlane.xlu1 %391  ;;  %v395_v11 = vpop.xlane.xlu0 %394 }
 0x315   :  { %602 = vrsqrt.f32 %v403_v4  ;;  %v400_v61 = vmul.f32 0.03125, %v392_v6  ;;  %v401_v12 = vmul.f32 0.03125, %v395_v11 }
 0x317   :  { %v404_v0 = vadd.f32 1e-12, %v400_v61  ;;  %v405_v13 = vadd.f32 1e-12, %v401_v12 }
 0x318   :  { %v398_v15 = vpop.xlane.xlu1 %397 }
 0x319   :  { %604 = vrsqrt.f32 %v404_v0  ;;  %v402_v16 = vmul.f32 0.03125, %v398_v15 }
 0x31a   :  { %606 = vrsqrt.f32 %v405_v13 }
 0x31b   :  { %v406_v17 = vadd.f32 1e-12, %v402_v16 }
 0x31d   :  { %608 = vrsqrt.f32 %v406_v17 }
 0x31f   :  { %v603_v18 = vpop.eup %602 }
 0x320   :  { %v411_v19 = vmul.f32 %v603_v18, %v379_v47 }
 0x322   :  { %v421_v20 = vmul.f32 %v461_v10, %v411_v19 }
 0x323   :  { %v605_v39 = vpop.eup %604 }
 0x324   :  { %v607_v21 = vpop.eup %606  ;;  %v431_v22 = vadd.f32 %v462_v14, %v421_v20  ;;  %v412_v40 = vmul.f32 %v605_v39, %v380_v54 }
 0x325   :  { %v413_v23 = vmul.f32 %v607_v21, %v381_v8 }
 0x326   :  { %435 = vst.msk [vmem:[#allocation2] sm:$0xff] %vm42_vm0, %v431_v22  ;;  %v422_v24 = vmul.f32 %v461_v10, %v412_v40 }
 0x327   :  { %v609_v25 = vpop.eup %608  ;;  %v423_v38 = vmul.f32 %v461_v10, %v413_v23 }
 0x328   :  { %v432_v26 = vadd.f32 %v462_v14, %v422_v24  ;;  %v414_v27 = vmul.f32 %v609_v25, %v382_v59 }
 0x329   :  { %v433_v36 = vadd.f32 %v462_v14, %v423_v38 }
 0x32a   :  { %436 = vst.msk [vmem:[#allocation2 + $0x8] sm:$0xff] %vm42_vm0, %v432_v26  ;;  %v424_v48 = vmul.f32 %v461_v10, %v414_v27 }
 0x32b   :  { %437 = vst.msk [vmem:[#allocation2 + $0x10] sm:$0xff] %vm42_vm0, %v433_v36 }
 0x32c   :  { %v434_v50 = vadd.f32 %v462_v14, %v424_v48 }
 0x32e   :  { %438 = vst.msk [vmem:[#allocation2 + $0x18] sm:$0xff] %vm42_vm0, %v434_v50 }
 0x32f   :  { %621 = shalt.err (!%p618_p4)
}
 0x330   :  { %s622_s30 = scalar_lea.hbm %s844_s7, 512 }
 0x331   :  { %p623_p5 = scmp.ne.s32.totalorder %s844_s7, %s622_s30  ;;  %p626_p6 = scmp.lt.u32.totalorder %s622_s30, %s844_s7 }
 0x333   :  { %p628_p7 = pnand %p626_p6, %p623_p5 }
 0x335   :  { %631 = shalt.err (!%p628_p7)
}
 0x336   :  { %s635_s12 = smov 128   ;;  %s636_s1 = smov 8  }
 0x337   :  { %450 = dma.vmem_to_hbm [thread:$0]  %s445_s27, 512, %s844_s7, [#allocation3], %s635_s12, %s635_s12, %s636_s1  }
 0x338   :  { %632 = dma.done.wait [#allocation3], 512  }
 0x339   :  { %633 = vsyncadd [#allocation3], 4294966784 }
 0x33a   :  { %454 = vsyncpa [#allocation3], 1 }

</bundles_post_ra>
